<compile_context>
chip_gen: v7x
topology: tpu7x:2x2x1
jax: 0.10.0
libtpu: 0.0.40
codegen_flags: <defaults>
</compile_context>

<pallas_src>
import functools

import jax
import jax.numpy as jnp
from jax.experimental import pallas as pl
from jax.experimental.pallas import tpu as pltpu


def _cdiv(a, b):
    return (a + b - 1) // b


def _round_up(x, m):
    return ((x + m - 1) // m) * m


def _fused_mlp_kernel(x_ref, *refs, num_layers: int):
    """Fused MLP on one (tm, in_dim) activation tile.

    refs = [w0, b0, w1, b1, ..., w_{L-1}, b_{L-1}, o_ref]
      w_i   : (Din_i, Dout_i) compute-dtype weights, VMEM-resident across grid
      b_i   : (1, Dout_i)     f32 biases
      o_ref : (tm, out_dim)   output tile
    Intermediate activations never touch HBM; only the last layer stores.
    """
    o_ref = refs[-1]
    compute_dtype = x_ref.dtype
    act = x_ref[...]
    for i in range(num_layers):
        w = refs[2 * i][...]
        b = refs[2 * i + 1][...]
        acc = jnp.dot(act, w, preferred_element_type=jnp.float32) + b  # MXU, f32 acc
        if i < num_layers - 1:
            act = jnp.maximum(acc, 0.0).astype(compute_dtype)          # ReLU (VPU)
        else:
            o_ref[...] = acc.astype(o_ref.dtype)


def pack_mlp_params(params, compute_dtype=jnp.float32):
    """Pack (w, b) pairs ONCE, outside the per-call forward path.

    params: list of (w: (in_features, out_features), b: (out_features,)) —
    weights stored transposed vs. torch's nn.Linear. Returns a flat tuple
    [w0, b0, w1, b1, ...] with weights in `compute_dtype` and biases as
    (1, out_features) float32.
    """
    ops = []
    for w, b in params:
        ops.append(jnp.asarray(w, compute_dtype))
        ops.append(jnp.asarray(b, jnp.float32).reshape(1, -1))
    return tuple(ops)


def mlp1_forward(x, packed_ops, *, tm_max=512, out_dtype=None):
    """Forward pass identical to MLP1.forward (ReLU on all but the last layer).

    x: (..., input_dim); packed_ops from pack_mlp_params. out_dtype defaults to
    x.dtype (set jnp.bfloat16 when downstream accepts it to halve store bytes).
    """
    num_layers = len(packed_ops) // 2
    lead = x.shape[:-1]
    in_dim = x.shape[-1]
    dims = [in_dim] + [packed_ops[2 * i].shape[1] for i in range(num_layers)]
    out_dim = dims[-1]
    compute_dtype = packed_ops[0].dtype
    out_dtype = x.dtype if out_dtype is None else out_dtype

    x2 = x.reshape(-1, in_dim).astype(compute_dtype)   # no-op when dtypes match
    M = x2.shape[0]

    # Balanced M tiles (multiples of 16 rows: full bf16 sublane packing). Force
    # >= 2 tiles whenever there's enough work so v7x megacore shards the M axis.
    min_tiles = 2 if M >= 32 else 1
    num_tiles = max(min_tiles, _cdiv(M, tm_max))
    tm = _round_up(_cdiv(M, num_tiles), 16)
    grid_m = _cdiv(M, tm)
    M_pad = grid_m * tm
    if M_pad != M:
        x2 = jnp.pad(x2, ((0, M_pad - M), (0, 0)))      # rows only; padding < 1 tile

    # BlockSpecs: x/out tile over M. Feature dims use their full extents (always
    # legal), so there is no lane padding and the output store is exactly
    # out_dim wide. Weights & biases are pinned at block (0, 0) and
    # single-buffered: constant index_map => fetched once, never re-fetched.
    in_specs = [pl.BlockSpec((tm, in_dim), lambda i: (i, 0))]
    for li in range(num_layers):
        w, b = packed_ops[2 * li], packed_ops[2 * li + 1]
        in_specs.append(pl.BlockSpec(w.shape, lambda i: (0, 0),
                                     pipeline_mode=pl.Buffered(1)))
        in_specs.append(pl.BlockSpec(b.shape, lambda i: (0, 0),
                                     pipeline_mode=pl.Buffered(1)))
    out_spec = pl.BlockSpec((tm, out_dim), lambda i: (i, 0))

    # VMEM budget: double-buffered x/out tiles + single-buffered params +
    # per-layer f32 accumulator / recast-activation temporaries (these live in
    # VMEM, not vregs, once they exceed the register file).
    c_bytes = jnp.dtype(compute_dtype).itemsize
    o_bytes = jnp.dtype(out_dtype).itemsize
    param_bytes = sum(int(o.size) * o.dtype.itemsize for o in packed_ops)
    max_d = max(dims)
    resident = (2 * tm * in_dim * c_bytes            # double-buffered x tiles
                + 2 * tm * out_dim * o_bytes         # double-buffered out tiles
                + param_bytes                        # Buffered(1) weights/biases
                + tm * max_d * (4 + c_bytes))        # f32 acc + recast activation
    try:
        vmem_cap = pltpu.get_tpu_info().vmem_capacity_bytes  # 128 MiB v5e/v6e, 64 MiB v7x
    except Exception:
        vmem_cap = 64 << 20
    vmem_limit = int(min(max(2 * resident, 16 << 20), int(0.85 * vmem_cap)))
    # TODO(synk): if param_bytes + tiles ever approaches ~0.6 * vmem_cap (large
    # hidden dims, esp. v7x's 64 MiB), switch to a K/N-tiled grid with an f32
    # scratch accumulator instead of this fully weights-resident path.

    flops = sum(2 * M_pad * dims[i] * dims[i + 1] for i in range(num_layers))
    bytes_accessed = (M_pad * in_dim * c_bytes + param_bytes
                      + M_pad * out_dim * o_bytes)

    kernel = functools.partial(_fused_mlp_kernel, num_layers=num_layers)
    yp = pl.pallas_call(
        kernel,
        out_shape=jax.ShapeDtypeStruct((M_pad, out_dim), out_dtype),
        grid_spec=pltpu.PrefetchScalarGridSpec(
            num_scalar_prefetch=0,
            grid=(grid_m,),
            in_specs=in_specs,
            out_specs=out_spec,
        ),
        compiler_params=pltpu.CompilerParams(
            dimension_semantics=("parallel",),     # megacore-shard M on v7x
            vmem_limit_bytes=vmem_limit,
        ),
        cost_estimate=pl.CostEstimate(
            flops=flops, transcendentals=0, bytes_accessed=bytes_accessed),
    )(x2, *packed_ops)

    if M_pad != M:
        yp = yp[:M]
    return yp.reshape(*lead, out_dim)


def init_mlp_params(key, input_dim, output_dim, hidden_dim, num_layers,
                    dtype=jnp.float32):
    """Deterministic init matching nn.Linear shapes (weights stored (in, out))."""
    h = [hidden_dim] * (num_layers - 1)
    dims_in = [input_dim] + h
    dims_out = h + [output_dim]
    params = []
    for n_in, n_out in zip(dims_in, dims_out):
        key, kw, kb = jax.random.split(key, 3)
        bound = 1.0 / (n_in ** 0.5)  # same bound as torch's default init
        w = jax.random.uniform(kw, (n_in, n_out), dtype, -bound, bound)
        b = jax.random.uniform(kb, (n_out,), dtype, -bound, bound)
        params.append((w, b))
    return params


if __name__ == "__main__":
    # Small shapes consistent with the module: batch=2, seq=8, input_dim=16,
    # hidden_dim=32, output_dim=8, num_layers=3.
    input_dim, hidden_dim, output_dim, num_layers = 16, 32, 8, 3
    key = jax.random.PRNGKey(0)
    kx, kp = jax.random.split(key)
    x = jax.random.normal(kx, (2, 8, input_dim), jnp.float32)

    params = init_mlp_params(kp, input_dim, output_dim, hidden_dim, num_layers)
    packed = pack_mlp_params(params)               # f32 compute: module semantics

    fwd = jax.jit(mlp1_forward)
    out = jax.block_until_ready(fwd(x, packed))
    assert out.shape == (2, 8, output_dim)

    # Pure-JAX float32 reference == PyTorch MLP1.forward semantics.
    ref = x.reshape(-1, input_dim)
    for i, (w, b) in enumerate(params):
        ref = jnp.matmul(ref, w, precision=jax.lax.Precision.HIGHEST) + b
        if i < num_layers - 1:
            ref = jnp.maximum(ref, 0.0)
    ref = ref.reshape(2, 8, output_dim)
    assert jnp.allclose(out, ref, atol=1e-2, rtol=1e-2), \
        float(jnp.max(jnp.abs(out - ref)))

    print("KERNEL_OK")
</pallas_src>

<mosaic_0001>
module attributes {stable_mosaic.version = 11 : i64} {
  func.func @_fused_mlp_kernel(%arg0: i32, %arg1: memref<16x16xf32, #tpu.memory_space<vmem>>, %arg2: memref<16x32xf32, #tpu.memory_space<vmem>>, %arg3: memref<1x32xf32, #tpu.memory_space<vmem>>, %arg4: memref<32x32xf32, #tpu.memory_space<vmem>>, %arg5: memref<1x32xf32, #tpu.memory_space<vmem>>, %arg6: memref<32x8xf32, #tpu.memory_space<vmem>>, %arg7: memref<1x8xf32, #tpu.memory_space<vmem>>, %arg8: memref<16x8xf32, #tpu.memory_space<vmem>>) attributes {dimension_semantics = [#tpu.dimension_semantics<parallel>], iteration_bounds = array<i64: 1>, scalar_prefetch = 0 : i64, scratch_operands = 0 : i64, tpu.core_type = #tpu.core_type<tc>, window_params = [{transform_indices = @transform_0, window_bounds = array<i64: 16, 16>}, {pipeline_mode = #tpu.pipeline_mode<synchronous>, transform_indices = @transform_1, window_bounds = array<i64: 16, 32>}, {pipeline_mode = #tpu.pipeline_mode<synchronous>, transform_indices = @transform_2, window_bounds = array<i64: 1, 32>}, {pipeline_mode = #tpu.pipeline_mode<synchronous>, transform_indices = @transform_3, window_bounds = array<i64: 32, 32>}, {pipeline_mode = #tpu.pipeline_mode<synchronous>, transform_indices = @transform_4, window_bounds = array<i64: 1, 32>}, {pipeline_mode = #tpu.pipeline_mode<synchronous>, transform_indices = @transform_5, window_bounds = array<i64: 32, 8>}, {pipeline_mode = #tpu.pipeline_mode<synchronous>, transform_indices = @transform_6, window_bounds = array<i64: 1, 8>}, {transform_indices = @transform_7, window_bounds = array<i64: 16, 8>}]} {
    %c0 = arith.constant 0 : index
    %c0_0 = arith.constant 0 : index
    %0 = vector.load %arg1[%c0, %c0_0] : memref<16x16xf32, #tpu.memory_space<vmem>>, vector<16x16xf32>
    %c0_1 = arith.constant 0 : index
    %c0_2 = arith.constant 0 : index
    %1 = vector.load %arg2[%c0_1, %c0_2] : memref<16x32xf32, #tpu.memory_space<vmem>>, vector<16x32xf32>
    %c0_3 = arith.constant 0 : index
    %c0_4 = arith.constant 0 : index
    %2 = vector.load %arg3[%c0_3, %c0_4] : memref<1x32xf32, #tpu.memory_space<vmem>>, vector<1x32xf32>
    %cst = arith.constant dense<0.000000e+00> : vector<16x32xf32>
    %3 = tpu.matmul %0, %1, %cst {dimension_numbers = #tpu.dot_dimension_numbers<[1], [0], [0], [1], [0, 0, 1, 1], [], []>} : vector<16x16xf32>, vector<16x32xf32>, vector<16x32xf32> -> vector<16x32xf32>
    %4 = vector.broadcast %2 : vector<1x32xf32> to vector<16x32xf32>
    %5 = arith.addf %3, %4 : vector<16x32xf32>
    %cst_5 = arith.constant 0.000000e+00 : f32
    %6 = vector.broadcast %cst_5 : f32 to vector<16x32xf32>
    %7 = arith.maximumf %5, %6 : vector<16x32xf32>
    %c0_6 = arith.constant 0 : index
    %c0_7 = arith.constant 0 : index
    %8 = vector.load %arg4[%c0_6, %c0_7] : memref<32x32xf32, #tpu.memory_space<vmem>>, vector<32x32xf32>
    %c0_8 = arith.constant 0 : index
    %c0_9 = arith.constant 0 : index
    %9 = vector.load %arg5[%c0_8, %c0_9] : memref<1x32xf32, #tpu.memory_space<vmem>>, vector<1x32xf32>
    %cst_10 = arith.constant dense<0.000000e+00> : vector<16x32xf32>
    %10 = tpu.matmul %7, %8, %cst_10 {dimension_numbers = #tpu.dot_dimension_numbers<[1], [0], [0], [1], [0, 0, 1, 1], [], []>} : vector<16x32xf32>, vector<32x32xf32>, vector<16x32xf32> -> vector<16x32xf32>
    %11 = vector.broadcast %9 : vector<1x32xf32> to vector<16x32xf32>
    %12 = arith.addf %10, %11 : vector<16x32xf32>
    %cst_11 = arith.constant 0.000000e+00 : f32
    %13 = vector.broadcast %cst_11 : f32 to vector<16x32xf32>
    %14 = arith.maximumf %12, %13 : vector<16x32xf32>
    %c0_12 = arith.constant 0 : index
    %c0_13 = arith.constant 0 : index
    %15 = vector.load %arg6[%c0_12, %c0_13] : memref<32x8xf32, #tpu.memory_space<vmem>>, vector<32x8xf32>
    %c0_14 = arith.constant 0 : index
    %c0_15 = arith.constant 0 : index
    %16 = vector.load %arg7[%c0_14, %c0_15] : memref<1x8xf32, #tpu.memory_space<vmem>>, vector<1x8xf32>
    %cst_16 = arith.constant dense<0.000000e+00> : vector<16x8xf32>
    %17 = tpu.matmul %14, %15, %cst_16 {dimension_numbers = #tpu.dot_dimension_numbers<[1], [0], [0], [1], [0, 0, 1, 1], [], []>} : vector<16x32xf32>, vector<32x8xf32>, vector<16x8xf32> -> vector<16x8xf32>
    %18 = vector.broadcast %16 : vector<1x8xf32> to vector<16x8xf32>
    %19 = arith.addf %17, %18 : vector<16x8xf32>
    %c0_17 = arith.constant 0 : index
    %c0_18 = arith.constant 0 : index
    %20 = vector.load %arg8[%c0_17, %c0_18] : memref<16x8xf32, #tpu.memory_space<vmem>>, vector<16x8xf32>
    tpu.vector_store %arg8[%c0_17, %c0_18], %19 {strides = array<i32>} : memref<16x8xf32, #tpu.memory_space<vmem>>, vector<16x8xf32>,
    return
  }
  func.func @transform_0(%arg0: i32) -> (i32, i32) {
    %c0_i32 = arith.constant 0 : i32
    %c0_i32_0 = arith.constant 0 : i32
    return %arg0, %c0_i32 : i32, i32
  }
  func.func @transform_1(%arg0: i32) -> (i32, i32) {
    %c0_i32 = arith.constant 0 : i32
    %c0_i32_0 = arith.constant 0 : i32
    %c0_i32_1 = arith.constant 0 : i32
    return %c0_i32, %c0_i32_0 : i32, i32
  }
  func.func @transform_2(%arg0: i32) -> (i32, i32) {
    %c0_i32 = arith.constant 0 : i32
    %c0_i32_0 = arith.constant 0 : i32
    %c0_i32_1 = arith.constant 0 : i32
    return %c0_i32, %c0_i32_0 : i32, i32
  }
  func.func @transform_3(%arg0: i32) -> (i32, i32) {
    %c0_i32 = arith.constant 0 : i32
    %c0_i32_0 = arith.constant 0 : i32
    %c0_i32_1 = arith.constant 0 : i32
    return %c0_i32, %c0_i32_0 : i32, i32
  }
  func.func @transform_4(%arg0: i32) -> (i32, i32) {
    %c0_i32 = arith.constant 0 : i32
    %c0_i32_0 = arith.constant 0 : i32
    %c0_i32_1 = arith.constant 0 : i32
    return %c0_i32, %c0_i32_0 : i32, i32
  }
  func.func @transform_5(%arg0: i32) -> (i32, i32) {
    %c0_i32 = arith.constant 0 : i32
    %c0_i32_0 = arith.constant 0 : i32
    %c0_i32_1 = arith.constant 0 : i32
    return %c0_i32, %c0_i32_0 : i32, i32
  }
  func.func @transform_6(%arg0: i32) -> (i32, i32) {
    %c0_i32 = arith.constant 0 : i32
    %c0_i32_0 = arith.constant 0 : i32
    %c0_i32_1 = arith.constant 0 : i32
    return %c0_i32, %c0_i32_0 : i32, i32
  }
  func.func @transform_7(%arg0: i32) -> (i32, i32) {
    %c0_i32 = arith.constant 0 : i32
    %c0_i32_0 = arith.constant 0 : i32
    return %arg0, %c0_i32 : i32, i32
  }
}

</mosaic_0001>

<bundles_post_ra>
// kernel: mlp1_forward.1
= control target key start
LH: loop header
LB: loop body
LE: loop exit
PB: predicated region body
PF: predicated region fallthrough
CT: control target
= control target key end

     0   :  { %12 = vsyncpa [#allocation3], 0  ;;  %s586_s0 = inlined_call_operand.vmem [shape: f32[16,16], index: 0, kind: input, shape index: {}]   ;;  %s587_s1 = inlined_call_operand.hbm [shape: f32[16,32], index: 1, kind: input, shape index: {}]   ;;  %s588_s2 = inlined_call_operand.vmem [shape: f32[1,32], index: 2, kind: input, shape index: {}]   ;;  %s589_s3 = inlined_call_operand.vmem [shape: f32[32,32], index: 3, kind: input, shape index: {}]   ;;  %s590_s4 = inlined_call_operand.vmem [shape: f32[1,32], index: 4, kind: input, shape index: {}]   ;;  %s591_s5 = inlined_call_operand.vmem [shape: f32[32,8], index: 5, kind: input, shape index: {}]   ;;  %s592_s6 = inlined_call_operand.vmem [shape: f32[1,8], index: 6, kind: input, shape index: {}]   ;;  %s593_s7 = inlined_call_operand.hbm [shape: f32[16,8], index: 7, kind: output, shape index: {}]  }
   0x1   :  { %13 = vsyncpa [#allocation4], 0  ;;  %s469_s24 = smov [#allocation2]   ;;  %s421_s28 = scalar_lea.hbm %s587_s1, 256 }
   0x2   :  { %s21_s25 = sshll.u32 %s469_s24, 4  ;;  %p422_p0 = scmp.ne.s32.totalorder %s587_s1, %s421_s28  ;;  %s22_s25 = int_to_ptr.vmem [resolvable:$true] %s21_s25 }
   0x3   :  { %p425_p1 = scmp.lt.u32.totalorder %s421_s28, %s587_s1 }
   0x5   :  { %p427_p2 = pnand %p425_p1, %p422_p0 }
   0x7   :  { %430 = shalt.err (!%p427_p2)
}
   0x8   :  { %s431_s10 = scalar_lea.vmem %s22_s25, 256  ;;  %p436_p4 = scmp.lt.s32.totalorder %s22_s25, %s22_s25 }
   0x9   :  { %p432_p3 = scmp.ne.s32.totalorder %s22_s25, %s431_s10  ;;  %p437_p5 = scmp.lt.s32.totalorder %s431_s10, %s431_s10 }
   0xb   :  { %p438_p6 = por %p437_p5, %p436_p4 }
   0xd   :  { %p439_p7 = pnand %p438_p6, %p432_p3 }
   0xf   :  { %442 = shalt.err (!%p439_p7)
}
  0x10   :  { %s470_s11 = smov 128   ;;  %s471_s12 = smov 8  }
  0x11   :  { %27 = dma.hbm_to_vmem [thread:$0]  %s587_s1, 256, %s22_s25, [#allocation3], %s470_s11, %s470_s11, %s471_s12  }
  0x12   :  { %465 = dma.done.wait [#allocation3], 256  }
  0x13   :  { %466 = vsyncadd [#allocation3], 4294967040  ;;  %vm52_vm0 = vcmask 130048   ;;  %v43_v0 = vld [vmem:[#allocation2] sm:$0xff]  ;;  %v44_v1 = vld [vmem:[#allocation2 + $0x8] sm:$0xff]  ;;  %vm147_vm1 = vcmask 261120  }
  0x14   :  { %v41_v2 = vld [vmem:[%s586_s0] sm:$0xff]  ;;  %v397_v3 = vpack.c.bf16 %v44_v1, %v43_v0  ;;  %v137_v5 = vld [vmem:[%s589_s3 + $0x8] sm:$0xff]  ;;  %v138_v8 = vld [vmem:[%s589_s3 + $0x10] sm:$0xff]  ;;  %vm323_vm2 = vcmask 64512  }
  0x15   :  { %372 = vmatprep.mubr.msk.f32.mxu0 %vm52_vm0, %v41_v2  ;;  %v136_v4 = vld [vmem:[%s589_s3] sm:$0xff]  ;;  %v42_v7 = vld [vmem:[%s586_s0 + $0x8] sm:$0xff]  ;;  %v139_v9 = vld [vmem:[%s589_s3 + $0x18] sm:$0xff] }
  0x16   :  { %v401_v6 = vpack.c.bf16 %v137_v5, %v136_v4  ;;  %398 = vmatprep.subr.bf16.mxu0 %v397_v3  ;;  %v405_v10 = vpack.c.bf16 %v139_v9, %v138_v8  ;;  %v231_v11 = vld [vmem:[%s591_s5] sm:$0xff]  ;;  %v232_v12 = vld [vmem:[%s591_s5 + $0x8] sm:$0xff]  ;;  %v233_v21 = vld [vmem:[%s591_s5 + $0x10] sm:$0xff] }
  0x17   :  { %400 = vmatpush3.bf16.msra.mxu0 %v397_v3  ;;  %v409_v13 = vpack.c.bf16 %v232_v12, %v231_v11  ;;  %v343_v14 = vld [vmem:[%s588_s2] ss:$0 sm:$0xff]  ;;  %v234_v22 = vld [vmem:[%s591_s5 + $0x18] sm:$0xff]  ;;  %s472_s5 = smov [#allocation5]  }
  0x18   :  { %402 = vmatprep.subr.bf16.mxu1 %v401_v6  ;;  %v413_v23 = vpack.c.bf16 %v234_v22, %v233_v21  ;;  %v346_v24 = vld [vmem:[%s590_s4] ss:$0 sm:$0xff]  ;;  %s331_s16 = sshll.u32 %s472_s5, 4  ;;  %s332_s16 = int_to_ptr.vmem [resolvable:$true] %s331_s16 }
  0x19   :  { %404 = vmatpush3.bf16.msra.mxu1 %v401_v6  ;;  %410 = vmatprep.subr.bf16.mxu0 %v409_v13  ;;  %v349_v31 = vld [vmem:[%s592_s6] ss:$0 sm:$0xff]  ;;  %s443_s4 = scalar_lea.vmem %s332_s16, 256  ;;  %p448_p9 = scmp.lt.s32.totalorder %s332_s16, %s332_s16 }
  0x1a   :  { %373 = vmatmul.mubr.msk.f32.vlgmr.msra.gmra.mrb[0].mxu0 %vm52_vm0, %v42_v7  ;;  %406 = vmatprep.subr.bf16.mxu1 %v405_v10  ;;  %p444_p8 = scmp.ne.s32.totalorder %s332_s16, %s443_s4  ;;  %p449_p10 = scmp.lt.s32.totalorder %s443_s4, %s443_s4 }
  0x1b   :  { %412 = vmatpush3.bf16.msra.mxu0 %v409_v13 }
  0x1c   :  { %414 = vmatprep.subr.bf16.mxu0 %v413_v23  ;;  %p450_p11 = por %p449_p10, %p448_p9 }
  0x1d   :  { %408 = vmatpush3.bf16.msra.mxu1 %v405_v10 }
  0x1e   :  { %p451_p12 = pnand %p450_p11, %p444_p8 }
  0x1f   :  { %416 = vmatpush3.bf16.msra.mxu0 %v413_v23 }
  0xed   :  { %v374_v15 = vpop.f32.mrb[0].mxu0 }
  0xee   :  { %v131_v16 = vadd.f32 %v374_v15, %v343_v14  ;;  %v125_v17 = vpop.f32.mrb[1].mxu0 }
  0xef   :  { %v126_v18 = vadd.f32 %v343_v14, %v125_v17 }
  0xf0   :  { %v135_v20 = vmax.f32 %v131_v16, 0.0 }
  0xf1   :  { %v134_v19 = vmax.f32 %v126_v18, 0.0 }
  0xf3   :  { %383 = vmatprep.mubr.msk.f32.mxu1 %vm147_vm1, %v134_v19 }
  0xf4   :  { %384 = vmatmul.mubr.msk.f32.vlgmr.msra.gmra.mrb[0].mxu1 %vm147_vm1, %v135_v20 }
 0x1c7   :  { %v385_v25 = vpop.f32.mrb[0].mxu1 }
 0x1c8   :  { %v226_v26 = vadd.f32 %v385_v25, %v346_v24  ;;  %v220_v27 = vpop.f32.mrb[1].mxu1 }
 0x1c9   :  { %v221_v28 = vadd.f32 %v346_v24, %v220_v27 }
 0x1ca   :  { %v230_v30 = vmax.f32 %v226_v26, 0.0 }
 0x1cb   :  { %v229_v29 = vmax.f32 %v221_v28, 0.0 }
 0x1cd   :  { %394 = vmatprep.mubr.msk.f32.mxu0 %vm147_vm1, %v229_v29 }
 0x1ce   :  { %395 = vmatmul.mubr.msk.f32.vlgmr.msra.gmra.mrb[2].mxu0 %vm147_vm1, %v230_v30 }
 0x2a1   :  { %v396_v32 = vpop.f32.mrb[2].mxu0 }
 0x2a2   :  { %v320_v33 = vadd.f32 %v396_v32, %v349_v31  ;;  %v314_v34 = vpop.f32.mrb[3].mxu0 }
 0x2a3   :  { %v315_v35 = vadd.f32 %v349_v31, %v314_v34 }
 0x2a4   :  { %325 = vst.msk [vmem:[#allocation5 + $0x8] sm:$0xff] %vm323_vm2, %v320_v33 }
 0x2a5   :  { %324 = vst.msk [vmem:[#allocation5] sm:$0xff] %vm323_vm2, %v315_v35 }
 0x2a6   :  { %454 = shalt.err (!%p451_p12)
}
 0x2a7   :  { %s455_s6 = scalar_lea.hbm %s593_s7, 256 }
 0x2a8   :  { %p456_p13 = scmp.ne.s32.totalorder %s593_s7, %s455_s6  ;;  %p459_p0 = scmp.lt.u32.totalorder %s455_s6, %s593_s7 }
 0x2aa   :  { %p461_p1 = pnand %p459_p0, %p456_p13 }
 0x2ac   :  { %464 = shalt.err (!%p461_p1)
}
 0x2ad   :  { %337 = dma.vmem_to_hbm [thread:$0]  %s332_s16, 256, %s593_s7, [#allocation4], %s470_s11, %s470_s11, %s471_s12  }
 0x2ae   :  { %467 = dma.done.wait [#allocation4], 256  }
 0x2af   :  { %468 = vsyncadd [#allocation4], 4294967040 }
 0x2b0   :  { %341 = vsyncpa [#allocation3], 1 }
 0x2b1   :  { %342 = vsyncpa [#allocation4], 1 }

</bundles_post_ra>
